<compile_context>
chip_gen: v6e
topology: v6e:2x2x1
jax: 0.10.0
libtpu: 0.0.40
codegen_flags: <defaults>
</compile_context>

<pallas_src>
import numpy as np
import jax
import jax.numpy as jnp
from jax.experimental import pallas as pl
from jax.experimental.pallas import tpu as pltpu

NC_PAD = 128  # classifier output lanes padded to 128 for unmasked stores


# ---------------------------------------------------------------------------
# helpers (host-side constant construction)
# ---------------------------------------------------------------------------
def _pool_sel_matrices(l_half, l_in):
    """0/1 selection matrices so MaxPool1d(k=2,s=2) == max(S_even @ h, S_odd @ h)."""
    se = np.zeros((l_half, l_in), np.float32)
    so = np.zeros((l_half, l_in), np.float32)
    idx = np.arange(l_half)
    se[idx, 2 * idx] = 1.0
    so[idx, 2 * idx + 1] = 1.0
    return jnp.asarray(se), jnp.asarray(so)


def _adaptive_pool_matrix(l_in, l_out=3):
    """Reproduces torch.nn.AdaptiveAvgPool1d bin boundaries exactly."""
    m = np.zeros((l_in, l_out), np.float32)
    for i in range(l_out):
        s = (i * l_in) // l_out
        e = -((-(i + 1) * l_in) // l_out)  # ceil
        m[s:e, i] = 1.0 / (e - s)
    return jnp.asarray(m)


# ---------------------------------------------------------------------------
# Fused kernel: one batch element per grid step, everything register/VMEM resident
# ---------------------------------------------------------------------------
def vgg1d_fused_kernel(x_ref, w1_ref, b1_ref, s1e_ref, s1o_ref,
                       w2_ref, b2_ref, s2e_ref, s2o_ref,
                       pt_ref, wf1_ref, fb1_ref, wf2_ref, fb2_ref,
                       o_ref):
    k = 3
    x = x_ref[0]                              # (L+2, C_in)  -- channels on lanes

    # ---- conv1 (k=3, pad=1) as one MXU matmul via im2col, + bias + ReLU ----
    l1 = s1e_ref.shape[1]                     # conv1 output length = L
    xcol = jnp.concatenate([x[t:t + l1, :] for t in range(k)], axis=1)     # (L, K*C_in)
    h1 = jnp.dot(xcol, w1_ref[...], preferred_element_type=jnp.float32) + b1_ref[...]
    h1 = jnp.maximum(h1, 0.0)                 # (L, 64)

    # ---- MaxPool1d(2): register-resident even/odd row selection on the MXU ----
    p1 = jnp.maximum(
        jnp.dot(s1e_ref[...], h1, preferred_element_type=jnp.float32),
        jnp.dot(s1o_ref[...], h1, preferred_element_type=jnp.float32))     # (L/2, 64)

    # ---- conv2 (k=3, pad=1) + bias + ReLU + MaxPool1d(2) ----
    l2 = s2e_ref.shape[1]                     # = L/2
    zrow = jnp.zeros((1, p1.shape[1]), jnp.float32)
    p1p = jnp.concatenate([zrow, p1, zrow], axis=0)                        # (L/2+2, 64)
    xcol2 = jnp.concatenate([p1p[t:t + l2, :] for t in range(k)], axis=1)  # (L/2, 192)
    h2 = jnp.dot(xcol2, w2_ref[...], preferred_element_type=jnp.float32) + b2_ref[...]
    h2 = jnp.maximum(h2, 0.0)                 # (L/2, 128)
    p2 = jnp.maximum(
        jnp.dot(s2e_ref[...], h2, preferred_element_type=jnp.float32),
        jnp.dot(s2o_ref[...], h2, preferred_element_type=jnp.float32))     # (L/4, 128)

    # ---- AdaptiveAvgPool1d(3) + flatten folded into the first Linear ----
    pooled = jnp.dot(pt_ref[...], p2, preferred_element_type=jnp.float32)  # (3, 128)
    hid = fb1_ref[...]                                                     # (1, hidden)
    for j in range(3):   # static unroll; flatten permutation is folded into wf1
        hid = hid + jnp.dot(pooled[j:j + 1, :], wf1_ref[j],
                            preferred_element_type=jnp.float32)
    hid = jnp.maximum(hid, 0.0)
    # TODO(synk): nn.Dropout is identity in eval/inference mode; training-mode dropout not implemented.
    out = jnp.dot(hid, wf2_ref[...], preferred_element_type=jnp.float32) + fb2_ref[...]
    o_ref[0] = out                            # (1, NC_PAD) lane-dense store


# ---------------------------------------------------------------------------
# Wrapper: one-time weight/layout glue + single pallas_call
# ---------------------------------------------------------------------------
def vgg1d_forward(x, params):
    n, c_in, l = x.shape
    assert l % 4 == 0 and l // 4 >= 3, "L must be divisible by 4 and L/4 >= 3"
    k = 3
    c1 = params["cw1"].shape[0]
    c2 = params["cw2"].shape[0]
    hidden = params["fw1"].shape[0]
    num_classes = params["fw2"].shape[0]
    assert num_classes <= NC_PAD

    # layout glue (one-time XLA ops): channels -> lanes, conv pad along length
    xt = jnp.transpose(x, (0, 2, 1))                       # (N, L, C_in)
    xp = jnp.pad(xt, ((0, 0), (1, 1), (0, 0)))             # (N, L+2, C_in)

    # conv weights -> im2col layout: (K*C_in, C_out), column order t*C_in + c_in
    w1 = jnp.transpose(params["cw1"], (2, 1, 0)).reshape(k * c_in, c1)
    w2 = jnp.transpose(params["cw2"], (2, 1, 0)).reshape(k * c1, c2)
    b1 = params["cb1"].reshape(1, c1)
    b2 = params["cb2"].reshape(1, c2)

    s1e, s1o = _pool_sel_matrices(l // 2, l)
    s2e, s2o = _pool_sel_matrices(l // 4, l // 2)
    pool_t = _adaptive_pool_matrix(l // 4, 3).T            # (3, L/4)

    # fold torch.flatten(x, 1) index ordering (c*3 + j) into the first Linear weight
    wf1 = jnp.transpose(params["fw1"].reshape(hidden, c2, 3), (2, 1, 0))   # (3, C2, hidden)
    fb1 = params["fb1"].reshape(1, hidden)
    wf2 = jnp.pad(params["fw2"].T, ((0, 0), (0, NC_PAD - num_classes)))    # (hidden, NC_PAD)
    fb2 = jnp.pad(params["fb2"].reshape(1, num_classes),
                  ((0, 0), (0, NC_PAD - num_classes)))                     # (1, NC_PAD)

    lp = l + 2
    rep2 = lambda i: (0, 0)      # weights: same block every grid step -> no re-DMA
    rep3 = lambda i: (0, 0, 0)

    out = pl.pallas_call(
        vgg1d_fused_kernel,
        out_shape=jax.ShapeDtypeStruct((n, 1, NC_PAD), jnp.float32),
        grid=(n,),   # TODO(synk): at large N/L, tile multiple samples / length chunks per step
        in_specs=[
            pl.BlockSpec((1, lp, c_in), lambda i: (i, 0, 0)),
            pl.BlockSpec((k * c_in, c1), rep2),
            pl.BlockSpec((1, c1), rep2),
            pl.BlockSpec((l // 2, l), rep2),
            pl.BlockSpec((l // 2, l), rep2),
            pl.BlockSpec((k * c1, c2), rep2),
            pl.BlockSpec((1, c2), rep2),
            pl.BlockSpec((l // 4, l // 2), rep2),
            pl.BlockSpec((l // 4, l // 2), rep2),
            pl.BlockSpec((3, l // 4), rep2),
            pl.BlockSpec((3, c2, hidden), rep3),
            pl.BlockSpec((1, hidden), rep2),
            pl.BlockSpec((hidden, NC_PAD), rep2),
            pl.BlockSpec((1, NC_PAD), rep2),
        ],
        out_specs=pl.BlockSpec((1, 1, NC_PAD), lambda i: (i, 0, 0)),
        compiler_params=pltpu.CompilerParams(
            dimension_semantics=("parallel",)),   # megacore split over batch on v7x
    )(xp, w1, b1, s1e, s1o, w2, b2, s2e, s2o, pool_t, wf1, fb1, wf2, fb2)

    return out[:, 0, :num_classes]


# ---------------------------------------------------------------------------
# Pure-JAX reference for validation
# ---------------------------------------------------------------------------
def vgg1d_reference(x, params):
    def conv_relu_pool(xx, w, b):
        y = jax.lax.conv_general_dilated(
            xx, w, window_strides=(1,), padding=((1, 1),),
            dimension_numbers=("NCH", "OIH", "NCH"))
        y = jnp.maximum(y + b[None, :, None], 0.0)
        nn, cc, ll = y.shape
        return jnp.max(y.reshape(nn, cc, ll // 2, 2), axis=-1)

    h = conv_relu_pool(x, params["cw1"], params["cb1"])
    h = conv_relu_pool(h, params["cw2"], params["cb2"])
    pm = _adaptive_pool_matrix(h.shape[2], 3)
    p = jnp.einsum("ncl,lk->nck", h, pm)
    f = p.reshape(p.shape[0], -1)
    z = jnp.maximum(f @ params["fw1"].T + params["fb1"], 0.0)
    return z @ params["fw2"].T + params["fb2"]


if __name__ == "__main__":
    N, C_IN, L = 2, 4, 32
    HIDDEN, NUM_CLASSES = 32, 10

    key = jax.random.PRNGKey(0)
    ks = jax.random.split(key, 10)
    params = {
        "cw1": 0.10 * jax.random.normal(ks[0], (64, C_IN, 3), jnp.float32),
        "cb1": 0.10 * jax.random.normal(ks[1], (64,), jnp.float32),
        "cw2": 0.05 * jax.random.normal(ks[2], (128, 64, 3), jnp.float32),
        "cb2": 0.05 * jax.random.normal(ks[3], (128,), jnp.float32),
        "fw1": 0.05 * jax.random.normal(ks[4], (HIDDEN, 128 * 3), jnp.float32),
        "fb1": 0.05 * jax.random.normal(ks[5], (HIDDEN,), jnp.float32),
        "fw2": 0.05 * jax.random.normal(ks[6], (NUM_CLASSES, HIDDEN), jnp.float32),
        "fb2": 0.05 * jax.random.normal(ks[7], (NUM_CLASSES,), jnp.float32),
    }
    x = jax.random.normal(ks[8], (N, C_IN, L), jnp.float32)

    fwd = jax.jit(vgg1d_forward)
    out = jax.block_until_ready(fwd(x, params))
    ref = jax.block_until_ready(vgg1d_reference(x, params))

    assert out.shape == (N, NUM_CLASSES)
    np.testing.assert_allclose(np.asarray(out), np.asarray(ref), rtol=1e-4, atol=1e-4)
    print("KERNEL_OK")
</pallas_src>

<mosaic_0001>
module attributes {stable_mosaic.version = 11 : i64} {
  func.func @vgg1d_fused_kernel(%arg0: i32, %arg1: memref<1x34x4xf32, #tpu.memory_space<vmem>>, %arg2: memref<12x64xf32, #tpu.memory_space<vmem>>, %arg3: memref<1x64xf32, #tpu.memory_space<vmem>>, %arg4: memref<16x32xf32, #tpu.memory_space<vmem>>, %arg5: memref<16x32xf32, #tpu.memory_space<vmem>>, %arg6: memref<192x128xf32, #tpu.memory_space<vmem>>, %arg7: memref<1x128xf32, #tpu.memory_space<vmem>>, %arg8: memref<8x16xf32, #tpu.memory_space<vmem>>, %arg9: memref<8x16xf32, #tpu.memory_space<vmem>>, %arg10: memref<3x8xf32, #tpu.memory_space<vmem>>, %arg11: memref<3x128x32xf32, #tpu.memory_space<vmem>>, %arg12: memref<1x32xf32, #tpu.memory_space<vmem>>, %arg13: memref<32x128xf32, #tpu.memory_space<vmem>>, %arg14: memref<1x128xf32, #tpu.memory_space<vmem>>, %arg15: memref<1x1x128xf32, #tpu.memory_space<vmem>>) attributes {dimension_semantics = [#tpu.dimension_semantics<parallel>], iteration_bounds = array<i64: 2>, scalar_prefetch = 0 : i64, scratch_operands = 0 : i64, tpu.core_type = #tpu.core_type<tc>, window_params = [{transform_indices = @transform_0, window_bounds = array<i64: 1, 34, 4>}, {pipeline_mode = #tpu.pipeline_mode<synchronous>, transform_indices = @transform_1, window_bounds = array<i64: 12, 64>}, {pipeline_mode = #tpu.pipeline_mode<synchronous>, transform_indices = @transform_2, window_bounds = array<i64: 1, 64>}, {pipeline_mode = #tpu.pipeline_mode<synchronous>, transform_indices = @transform_3, window_bounds = array<i64: 16, 32>}, {pipeline_mode = #tpu.pipeline_mode<synchronous>, transform_indices = @transform_4, window_bounds = array<i64: 16, 32>}, {pipeline_mode = #tpu.pipeline_mode<synchronous>, transform_indices = @transform_5, window_bounds = array<i64: 192, 128>}, {pipeline_mode = #tpu.pipeline_mode<synchronous>, transform_indices = @transform_6, window_bounds = array<i64: 1, 128>}, {pipeline_mode = #tpu.pipeline_mode<synchronous>, transform_indices = @transform_7, window_bounds = array<i64: 8, 16>}, {pipeline_mode = #tpu.pipeline_mode<synchronous>, transform_indices = @transform_8, window_bounds = array<i64: 8, 16>}, {pipeline_mode = #tpu.pipeline_mode<synchronous>, transform_indices = @transform_9, window_bounds = array<i64: 3, 8>}, {pipeline_mode = #tpu.pipeline_mode<synchronous>, transform_indices = @transform_10, window_bounds = array<i64: 3, 128, 32>}, {pipeline_mode = #tpu.pipeline_mode<synchronous>, transform_indices = @transform_11, window_bounds = array<i64: 1, 32>}, {pipeline_mode = #tpu.pipeline_mode<synchronous>, transform_indices = @transform_12, window_bounds = array<i64: 32, 128>}, {pipeline_mode = #tpu.pipeline_mode<synchronous>, transform_indices = @transform_13, window_bounds = array<i64: 1, 128>}, {transform_indices = @transform_14, window_bounds = array<i64: 1, 1, 128>}]} {
    %c0 = arith.constant 0 : index
    %c0_0 = arith.constant 0 : index
    %c0_1 = arith.constant 0 : index
    %0 = vector.load %arg1[%c0, %c0_0, %c0_1] : memref<1x34x4xf32, #tpu.memory_space<vmem>>, vector<1x34x4xf32>
    %1 = vector.shape_cast %0 : vector<1x34x4xf32> to vector<34x4xf32>
    %2 = vector.extract_strided_slice %1 {offsets = [0, 0], sizes = [32, 4], strides = [1, 1]} : vector<34x4xf32> to vector<32x4xf32>
    %3 = vector.extract_strided_slice %1 {offsets = [1, 0], sizes = [32, 4], strides = [1, 1]} : vector<34x4xf32> to vector<32x4xf32>
    %4 = vector.extract_strided_slice %1 {offsets = [2, 0], sizes = [32, 4], strides = [1, 1]} : vector<34x4xf32> to vector<32x4xf32>
    %5 = tpu.concatenate %2, %3, %4 in 1 : vector<32x4xf32>, vector<32x4xf32>, vector<32x4xf32> -> vector<32x12xf32>
    %c0_2 = arith.constant 0 : index
    %c0_3 = arith.constant 0 : index
    %6 = vector.load %arg2[%c0_2, %c0_3] : memref<12x64xf32, #tpu.memory_space<vmem>>, vector<12x64xf32>
    %cst = arith.constant dense<0.000000e+00> : vector<32x64xf32>
    %7 = tpu.matmul %5, %6, %cst {dimension_numbers = #tpu.dot_dimension_numbers<[1], [0], [0], [1], [0, 0, 1, 1], [], []>} : vector<32x12xf32>, vector<12x64xf32>, vector<32x64xf32> -> vector<32x64xf32>
    %c0_4 = arith.constant 0 : index
    %c0_5 = arith.constant 0 : index
    %8 = vector.load %arg3[%c0_4, %c0_5] : memref<1x64xf32, #tpu.memory_space<vmem>>, vector<1x64xf32>
    %9 = vector.broadcast %8 : vector<1x64xf32> to vector<32x64xf32>
    %10 = arith.addf %7, %9 : vector<32x64xf32>
    %cst_6 = arith.constant 0.000000e+00 : f32
    %11 = vector.broadcast %cst_6 : f32 to vector<32x64xf32>
    %12 = arith.maximumf %10, %11 : vector<32x64xf32>
    %c0_7 = arith.constant 0 : index
    %c0_8 = arith.constant 0 : index
    %13 = vector.load %arg4[%c0_7, %c0_8] : memref<16x32xf32, #tpu.memory_space<vmem>>, vector<16x32xf32>
    %cst_9 = arith.constant dense<0.000000e+00> : vector<16x64xf32>
    %14 = tpu.matmul %13, %12, %cst_9 {dimension_numbers = #tpu.dot_dimension_numbers<[1], [0], [0], [1], [0, 0, 1, 1], [], []>} : vector<16x32xf32>, vector<32x64xf32>, vector<16x64xf32> -> vector<16x64xf32>
    %c0_10 = arith.constant 0 : index
    %c0_11 = arith.constant 0 : index
    %15 = vector.load %arg5[%c0_10, %c0_11] : memref<16x32xf32, #tpu.memory_space<vmem>>, vector<16x32xf32>
    %cst_12 = arith.constant dense<0.000000e+00> : vector<16x64xf32>
    %16 = tpu.matmul %15, %12, %cst_12 {dimension_numbers = #tpu.dot_dimension_numbers<[1], [0], [0], [1], [0, 0, 1, 1], [], []>} : vector<16x32xf32>, vector<32x64xf32>, vector<16x64xf32> -> vector<16x64xf32>
    %17 = arith.maximumf %14, %16 : vector<16x64xf32>
    %cst_13 = arith.constant 0.000000e+00 : f32
    %18 = vector.broadcast %cst_13 : f32 to vector<1x64xf32>
    %19 = tpu.concatenate %18, %17, %18 in 0 : vector<1x64xf32>, vector<16x64xf32>, vector<1x64xf32> -> vector<18x64xf32>
    %20 = vector.extract_strided_slice %19 {offsets = [0, 0], sizes = [16, 64], strides = [1, 1]} : vector<18x64xf32> to vector<16x64xf32>
    %21 = vector.extract_strided_slice %19 {offsets = [1, 0], sizes = [16, 64], strides = [1, 1]} : vector<18x64xf32> to vector<16x64xf32>
    %22 = vector.extract_strided_slice %19 {offsets = [2, 0], sizes = [16, 64], strides = [1, 1]} : vector<18x64xf32> to vector<16x64xf32>
    %23 = tpu.concatenate %20, %21, %22 in 1 : vector<16x64xf32>, vector<16x64xf32>, vector<16x64xf32> -> vector<16x192xf32>
    %c0_14 = arith.constant 0 : index
    %c0_15 = arith.constant 0 : index
    %24 = vector.load %arg6[%c0_14, %c0_15] : memref<192x128xf32, #tpu.memory_space<vmem>>, vector<192x128xf32>
    %cst_16 = arith.constant dense<0.000000e+00> : vector<16x128xf32>
    %25 = tpu.matmul %23, %24, %cst_16 {dimension_numbers = #tpu.dot_dimension_numbers<[1], [0], [0], [1], [0, 0, 1, 1], [], []>} : vector<16x192xf32>, vector<192x128xf32>, vector<16x128xf32> -> vector<16x128xf32>
    %c0_17 = arith.constant 0 : index
    %c0_18 = arith.constant 0 : index
    %26 = vector.load %arg7[%c0_17, %c0_18] : memref<1x128xf32, #tpu.memory_space<vmem>>, vector<1x128xf32>
    %27 = vector.broadcast %26 : vector<1x128xf32> to vector<16x128xf32>
    %28 = arith.addf %25, %27 : vector<16x128xf32>
    %cst_19 = arith.constant 0.000000e+00 : f32
    %29 = vector.broadcast %cst_19 : f32 to vector<16x128xf32>
    %30 = arith.maximumf %28, %29 : vector<16x128xf32>
    %c0_20 = arith.constant 0 : index
    %c0_21 = arith.constant 0 : index
    %31 = vector.load %arg8[%c0_20, %c0_21] : memref<8x16xf32, #tpu.memory_space<vmem>>, vector<8x16xf32>
    %cst_22 = arith.constant dense<0.000000e+00> : vector<8x128xf32>
    %32 = tpu.matmul %31, %30, %cst_22 {dimension_numbers = #tpu.dot_dimension_numbers<[1], [0], [0], [1], [0, 0, 1, 1], [], []>} : vector<8x16xf32>, vector<16x128xf32>, vector<8x128xf32> -> vector<8x128xf32>
    %c0_23 = arith.constant 0 : index
    %c0_24 = arith.constant 0 : index
    %33 = vector.load %arg9[%c0_23, %c0_24] : memref<8x16xf32, #tpu.memory_space<vmem>>, vector<8x16xf32>
    %cst_25 = arith.constant dense<0.000000e+00> : vector<8x128xf32>
    %34 = tpu.matmul %33, %30, %cst_25 {dimension_numbers = #tpu.dot_dimension_numbers<[1], [0], [0], [1], [0, 0, 1, 1], [], []>} : vector<8x16xf32>, vector<16x128xf32>, vector<8x128xf32> -> vector<8x128xf32>
    %35 = arith.maximumf %32, %34 : vector<8x128xf32>
    %c0_26 = arith.constant 0 : index
    %c0_27 = arith.constant 0 : index
    %36 = vector.load %arg10[%c0_26, %c0_27] : memref<3x8xf32, #tpu.memory_space<vmem>>, vector<3x8xf32>
    %cst_28 = arith.constant dense<0.000000e+00> : vector<3x128xf32>
    %37 = tpu.matmul %36, %35, %cst_28 {dimension_numbers = #tpu.dot_dimension_numbers<[1], [0], [0], [1], [0, 0, 1, 1], [], []>} : vector<3x8xf32>, vector<8x128xf32>, vector<3x128xf32> -> vector<3x128xf32>
    %c0_29 = arith.constant 0 : index
    %c0_30 = arith.constant 0 : index
    %38 = vector.load %arg12[%c0_29, %c0_30] : memref<1x32xf32, #tpu.memory_space<vmem>>, vector<1x32xf32>
    %39 = vector.extract_strided_slice %37 {offsets = [0, 0], sizes = [1, 128], strides = [1, 1]} : vector<3x128xf32> to vector<1x128xf32>
    %c0_31 = arith.constant 0 : index
    %c0_32 = arith.constant 0 : index
    %c0_33 = arith.constant 0 : index
    %40 = vector.load %arg11[%c0_31, %c0_32, %c0_33] : memref<3x128x32xf32, #tpu.memory_space<vmem>>, vector<1x128x32xf32>
    %41 = vector.shape_cast %40 : vector<1x128x32xf32> to vector<128x32xf32>
    %cst_34 = arith.constant dense<0.000000e+00> : vector<1x32xf32>
    %42 = tpu.matmul %39, %41, %cst_34 {dimension_numbers = #tpu.dot_dimension_numbers<[1], [0], [0], [1], [0, 0, 1, 1], [], []>} : vector<1x128xf32>, vector<128x32xf32>, vector<1x32xf32> -> vector<1x32xf32>
    %43 = arith.addf %38, %42 : vector<1x32xf32>
    %44 = vector.extract_strided_slice %37 {offsets = [1, 0], sizes = [1, 128], strides = [1, 1]} : vector<3x128xf32> to vector<1x128xf32>
    %c1 = arith.constant 1 : index
    %c0_35 = arith.constant 0 : index
    %c0_36 = arith.constant 0 : index
    %45 = vector.load %arg11[%c1, %c0_35, %c0_36] : memref<3x128x32xf32, #tpu.memory_space<vmem>>, vector<1x128x32xf32>
    %46 = vector.shape_cast %45 : vector<1x128x32xf32> to vector<128x32xf32>
    %cst_37 = arith.constant dense<0.000000e+00> : vector<1x32xf32>
    %47 = tpu.matmul %44, %46, %cst_37 {dimension_numbers = #tpu.dot_dimension_numbers<[1], [0], [0], [1], [0, 0, 1, 1], [], []>} : vector<1x128xf32>, vector<128x32xf32>, vector<1x32xf32> -> vector<1x32xf32>
    %48 = arith.addf %43, %47 : vector<1x32xf32>
    %49 = vector.extract_strided_slice %37 {offsets = [2, 0], sizes = [1, 128], strides = [1, 1]} : vector<3x128xf32> to vector<1x128xf32>
    %c2 = arith.constant 2 : index
    %c0_38 = arith.constant 0 : index
    %c0_39 = arith.constant 0 : index
    %50 = vector.load %arg11[%c2, %c0_38, %c0_39] : memref<3x128x32xf32, #tpu.memory_space<vmem>>, vector<1x128x32xf32>
    %51 = vector.shape_cast %50 : vector<1x128x32xf32> to vector<128x32xf32>
    %cst_40 = arith.constant dense<0.000000e+00> : vector<1x32xf32>
    %52 = tpu.matmul %49, %51, %cst_40 {dimension_numbers = #tpu.dot_dimension_numbers<[1], [0], [0], [1], [0, 0, 1, 1], [], []>} : vector<1x128xf32>, vector<128x32xf32>, vector<1x32xf32> -> vector<1x32xf32>
    %53 = arith.addf %48, %52 : vector<1x32xf32>
    %cst_41 = arith.constant 0.000000e+00 : f32
    %54 = vector.broadcast %cst_41 : f32 to vector<1x32xf32>
    %55 = arith.maximumf %53, %54 : vector<1x32xf32>
    %c0_42 = arith.constant 0 : index
    %c0_43 = arith.constant 0 : index
    %56 = vector.load %arg13[%c0_42, %c0_43] : memref<32x128xf32, #tpu.memory_space<vmem>>, vector<32x128xf32>
    %cst_44 = arith.constant dense<0.000000e+00> : vector<1x128xf32>
    %57 = tpu.matmul %55, %56, %cst_44 {dimension_numbers = #tpu.dot_dimension_numbers<[1], [0], [0], [1], [0, 0, 1, 1], [], []>} : vector<1x32xf32>, vector<32x128xf32>, vector<1x128xf32> -> vector<1x128xf32>
    %c0_45 = arith.constant 0 : index
    %c0_46 = arith.constant 0 : index
    %58 = vector.load %arg14[%c0_45, %c0_46] : memref<1x128xf32, #tpu.memory_space<vmem>>, vector<1x128xf32>
    %59 = arith.addf %57, %58 : vector<1x128xf32>
    %c0_47 = arith.constant 0 : index
    %c0_48 = arith.constant 0 : index
    %c0_49 = arith.constant 0 : index
    %60 = vector.load %arg15[%c0_47, %c0_48, %c0_49] : memref<1x1x128xf32, #tpu.memory_space<vmem>>, vector<1x1x128xf32>
    %61 = vector.shape_cast %60 : vector<1x1x128xf32> to vector<1x128xf32>
    %62 = vector.shape_cast %59 : vector<1x128xf32> to vector<1x1x128xf32>
    tpu.vector_store %arg15[%c0_47, %c0_48, %c0_49], %62 {strides = array<i32>} : memref<1x1x128xf32, #tpu.memory_space<vmem>>, vector<1x1x128xf32>,
    return
  }
  func.func @transform_0(%arg0: i32) -> (i32, i32, i32) {
    %c0_i32 = arith.constant 0 : i32
    %c0_i32_0 = arith.constant 0 : i32
    %c0_i32_1 = arith.constant 0 : i32
    return %arg0, %c0_i32, %c0_i32_0 : i32, i32, i32
  }
  func.func @transform_1(%arg0: i32) -> (i32, i32) {
    %c0_i32 = arith.constant 0 : i32
    %c0_i32_0 = arith.constant 0 : i32
    %c0_i32_1 = arith.constant 0 : i32
    return %c0_i32, %c0_i32_0 : i32, i32
  }
  func.func @transform_2(%arg0: i32) -> (i32, i32) {
    %c0_i32 = arith.constant 0 : i32
    %c0_i32_0 = arith.constant 0 : i32
    %c0_i32_1 = arith.constant 0 : i32
    return %c0_i32, %c0_i32_0 : i32, i32
  }
  func.func @transform_3(%arg0: i32) -> (i32, i32) {
    %c0_i32 = arith.constant 0 : i32
    %c0_i32_0 = arith.constant 0 : i32
    %c0_i32_1 = arith.constant 0 : i32
    return %c0_i32, %c0_i32_0 : i32, i32
  }
  func.func @transform_4(%arg0: i32) -> (i32, i32) {
    %c0_i32 = arith.constant 0 : i32
    %c0_i32_0 = arith.constant 0 : i32
    %c0_i32_1 = arith.constant 0 : i32
    return %c0_i32, %c0_i32_0 : i32, i32
  }
  func.func @transform_5(%arg0: i32) -> (i32, i32) {
    %c0_i32 = arith.constant 0 : i32
    %c0_i32_0 = arith.constant 0 : i32
    %c0_i32_1 = arith.constant 0 : i32
    return %c0_i32, %c0_i32_0 : i32, i32
  }
  func.func @transform_6(%arg0: i32) -> (i32, i32) {
    %c0_i32 = arith.constant 0 : i32
    %c0_i32_0 = arith.constant 0 : i32
    %c0_i32_1 = arith.constant 0 : i32
    return %c0_i32, %c0_i32_0 : i32, i32
  }
  func.func @transform_7(%arg0: i32) -> (i32, i32) {
    %c0_i32 = arith.constant 0 : i32
    %c0_i32_0 = arith.constant 0 : i32
    %c0_i32_1 = arith.constant 0 : i32
    return %c0_i32, %c0_i32_0 : i32, i32
  }
  func.func @transform_8(%arg0: i32) -> (i32, i32) {
    %c0_i32 = arith.constant 0 : i32
    %c0_i32_0 = arith.constant 0 : i32
    %c0_i32_1 = arith.constant 0 : i32
    return %c0_i32, %c0_i32_0 : i32, i32
  }
  func.func @transform_9(%arg0: i32) -> (i32, i32) {
    %c0_i32 = arith.constant 0 : i32
    %c0_i32_0 = arith.constant 0 : i32
    %c0_i32_1 = arith.constant 0 : i32
    return %c0_i32, %c0_i32_0 : i32, i32
  }
  func.func @transform_10(%arg0: i32) -> (i32, i32, i32) {
    %c0_i32 = arith.constant 0 : i32
    %c0_i32_0 = arith.constant 0 : i32
    %c0_i32_1 = arith.constant 0 : i32
    %c0_i32_2 = arith.constant 0 : i32
    return %c0_i32, %c0_i32_0, %c0_i32_1 : i32, i32, i32
  }
  func.func @transform_11(%arg0: i32) -> (i32, i32) {
    %c0_i32 = arith.constant 0 : i32
    %c0_i32_0 = arith.constant 0 : i32
    %c0_i32_1 = arith.constant 0 : i32
    return %c0_i32, %c0_i32_0 : i32, i32
  }
  func.func @transform_12(%arg0: i32) -> (i32, i32) {
    %c0_i32 = arith.constant 0 : i32
    %c0_i32_0 = arith.constant 0 : i32
    %c0_i32_1 = arith.constant 0 : i32
    return %c0_i32, %c0_i32_0 : i32, i32
  }
  func.func @transform_13(%arg0: i32) -> (i32, i32) {
    %c0_i32 = arith.constant 0 : i32
    %c0_i32_0 = arith.constant 0 : i32
    %c0_i32_1 = arith.constant 0 : i32
    return %c0_i32, %c0_i32_0 : i32, i32
  }
  func.func @transform_14(%arg0: i32) -> (i32, i32, i32) {
    %c0_i32 = arith.constant 0 : i32
    %c0_i32_0 = arith.constant 0 : i32
    %c0_i32_1 = arith.constant 0 : i32
    return %arg0, %c0_i32, %c0_i32_0 : i32, i32, i32
  }
}

</mosaic_0001>

<bundles_post_ra>
// kernel: vgg1d_forward.1
= control target key start
LH: loop header
LB: loop body
LE: loop exit
PB: predicated region body
PF: predicated region fallthrough
CT: control target
= control target key end

     0   :  { %s2581_s0 = inlined_call_operand.vmem [shape: f32[2,34,4], index: 0, kind: input, shape index: {}]   ;;  %s2582_s1 = inlined_call_operand.vmem [shape: f32[12,64], index: 1, kind: input, shape index: {}]   ;;  %s2583_s2 = inlined_call_operand.vmem [shape: f32[1,64], index: 2, kind: input, shape index: {}]   ;;  %s2584_s3 = inlined_call_operand.vmem [shape: f32[16,32], index: 3, kind: input, shape index: {}]   ;;  %s2585_s4 = inlined_call_operand.vmem [shape: f32[16,32], index: 4, kind: input, shape index: {}]   ;;  %s2586_s5 = inlined_call_operand.vmem [shape: f32[192,128], index: 5, kind: input, shape index: {}]   ;;  %s2587_s6 = inlined_call_operand.vmem [shape: f32[1,128], index: 6, kind: input, shape index: {}]   ;;  %s2588_s7 = inlined_call_operand.vmem [shape: f32[8,16], index: 7, kind: input, shape index: {}]   ;;  %s2589_s8 = inlined_call_operand.vmem [shape: f32[8,16], index: 8, kind: input, shape index: {}]   ;;  %s2590_s9 = inlined_call_operand.vmem [shape: f32[3,8], index: 9, kind: input, shape index: {}]   ;;  %s2591_s10 = inlined_call_operand.vmem [shape: f32[3,128,32], index: 10, kind: input, shape index: {}]   ;;  %s2592_s11 = inlined_call_operand.vmem [shape: f32[1,32], index: 11, kind: input, shape index: {}]   ;;  %s2593_s12 = inlined_call_operand.vmem [shape: f32[32,128], index: 12, kind: input, shape index: {}]   ;;  %s2594_s13 = inlined_call_operand.vmem [shape: f32[1,128], index: 13, kind: input, shape index: {}]   ;;  %s2595_s14 = inlined_call_operand.hbm [shape: f32[2,1,128], index: 14, kind: output, shape index: {}]  }
   0x1   :  { %2597 = sst [smem:[#allocation7_spill]] %s2581_s0 }
   0x2   :  { %2598 = sst [smem:[#allocation8_spill]] %s2582_s1 }
   0x3   :  { %19 = vsyncpa [#allocation3], 0 }
   0x4   :  { %21 = vsyncpa [#allocation3 + $0x1], 0  ;;  %s2092_s29 = smov 0   ;;  %s2094_s30 = smov 0  }
   0x5   :  { %s2096_s15 = smov 0   ;;  %s2098_s16 = smov 0  }
   0x6 LB: > { %2599 = sst [smem:[#allocation5_spill]] %s2005_s15  ;;  %s2113_s17 = sadd.s32 4294967295, %s2009_s16   ;;  %s2009_s16 = sphi %s2098_s16, %s2609_s16   ;;  %s2005_s15 = sphi %s2096_s15, %s2606_s15   ;;  %s2001_s30 = sphi %s2094_s30, %s2608_s30   ;;  %s1997_s29 = sphi %s2092_s29, %s2607_s29  }
   0x7   : > { %s1598_s18 = sadd.s32 4294967294, %s2009_s16   ;;  %s2117_s19 = sadd.s32 1, %s2009_s16  }
   0x8   : > { %s333_s20 = sadd.s32 1, %s2005_s15  ;;  %s330_s21 = ssub.s32 %s2009_s16, %s2117_s19 }
   0x9   : > { %p343_p0 = scmp.ne.s32.totalorder %s2005_s15, %s2001_s30  ;;  %p331_p1 = scmp.eq.s32.totalorder %s330_s21, 0 }
   0xa   : > { %p344_p2 = scmp.eq.s32.totalorder %s2113_s17, 1  ;;  %p349_p3 = scmp.ne.s32.totalorder %s2001_s30, %s1997_s29 }
   0xb   : > { %p350_p4 = scmp.eq.s32.totalorder %s1598_s18, 1  ;;  %p1601_p7 = scmp.ge.s32.totalorder %s2009_s16, 1 }
   0xc   : > { %s2128_s22 = scalar_select %p331_p1, %s2005_s15, %s333_s20  }
   0xd   : > { %p2130_p5 = por %p344_p2, %p343_p0  ;;  %p2134_p6 = por %p350_p4, %p349_p3 }
   0xe   : > { %2600 = sst [smem:[#allocation6_spill]] %s2128_s22  ;;  %p415_p8 = scmp.lt.s32.totalorder %s2009_s16, 3 }
  0x10   : > { %p416_p9 = pnand %p1601_p7, %p415_p8 }
  0x11   : > { %p460_p10 = scmp.lt.s32.totalorder (!%p416_p9), %s2113_s17, 1  ;;  %s2603_s1 = sld [smem:[#allocation8_spill]] (!%p416_p9) }
  0x12   : > { %419 = sbr.rel (%p416_p9) target bundleno = 1722 (0x6ba), region = 76  ;;  %s2604_s0 = sld [smem:[#allocation7_spill]] (!%p416_p9) }
  0x13   : > { %s2011_s25 = smov (!%p416_p9), 8   ;;  %s2012_s22 = smov (!%p416_p9), 4  }
  0x14   : > { %s458_s27 = sand.u32 (!%p416_p9), 1, %s2001_s30   ;;  %s2016_s28 = smov (!%p416_p9), [#allocation2]  }
  0x15   : > { %s459_s21 = scalar_lea.vmem (!%p416_p9), [#allocation2], %s458_s27 }
  0x17   : > { %vm551_vm0 = vcmask 1043456   ;;  %v530_v0 = vld [vmem:[%s2603_s1 + $0x8] sm:$0xf]  ;;  %v529_v1 = vld [vmem:[%s2603_s1] sm:$0xff]  ;;  %s461_s18 = scalar_select %p460_p10, %s2113_s17, 1  ;;  %vm497_vm1 = vcmask 1045504  }
  0x18   : > { %1737 = vmatprep.subr.msk.mxu1 %vm551_vm0, %v530_v0  ;;  %vm475_vm2 = vcmask 1046528   ;;  %vm519_vm3 = vcmask 31744   ;;  %vm524_vm4 = vcmask 64512   ;;  %vm538_vm5 = vcmask 97280   ;;  %v644_v41 = vld [vmem:[%s2584_s3] sm:$0xff]  ;;  %v645_v56 = vld [vmem:[%s2584_s3 + $0x8] sm:$0xff] }
  0x19   : > { %1738 = vmatpush3.msk.msra.mxu1 %vm551_vm0, %v530_v0  ;;  %s1904_s20 = smul.u32 40, %s461_s18  ;;  %vm646_vm6 = vcmask 261120   ;;  %v728_v42 = vld [vmem:[%s2585_s4] sm:$0xff]  ;;  %v729_v57 = vld [vmem:[%s2585_s4 + $0x8] sm:$0xff]  ;;  %v860_v58 = vld [vmem:[%s2586_s5 + $0x78] sm:$0xff]  ;;  %v2013_v59 = vmov 0.0  }
  0x1a   : > { %1739 = vmatprep.subr.mxu1 %v529_v1  ;;  %1766 = vmatprep.mubr.msk.f32.mxu0 %vm646_vm6, %v728_v42  ;;  %v1603_v45 = vld [vmem:[%s2583_s2] ss:$0 sm:$0xff]  ;;  %v859_v60 = vld [vmem:[%s2586_s5 + $0x70] sm:$0xff]  ;;  %v858_v61 = vld [vmem:[%s2586_s5 + $0x68] sm:$0xff]  ;;  %vm815_vm7 = vcmask 1040384   ;;  %vm842_vm8 = vcmask 523264  }
  0x1b   : > { %1740 = vmatpush3.msra.mxu1 %v529_v1  ;;  %s464_s15 = scalar_lea.vmem %s2604_s0, %s1904_s20  ;;  %v857_v62 = vld [vmem:[%s2586_s5 + $0x60] sm:$0xff]  ;;  %v856_v63 = vld [vmem:[%s2586_s5 + $0x58] sm:$0xff]  ;;  %v855_v0 = vld [vmem:[%s2586_s5 + $0x50] sm:$0xff]  ;;  %s2014_s18 = smov 64   ;;  %vm2015_vm9 = vmmov 0   ;;  %vm958_vm10 = vcmask 130048  }
  0x1c   : > { %v465_v2 = vld [vmem:[%s464_s15] sm:$0xff]  ;;  %v466_v3 = vld [vmem:[%s464_s15 + $0x8] sm:$0xff]  ;;  %v467_v4 = vld [vmem:[%s464_s15 + $0x10] sm:$0xff]  ;;  %s1652_s20 = sshll.u32 %s2113_s17, 4  ;;  %s1531_s0 = scalar_lea.sflag [#allocation3], %s458_s27 }
  0x1d   : > { %v498_v5 = vrot.slane %v465_v2, 2  ;;  %v499_v6 = vrot.slane %v466_v3, 2  ;;  %v476_v7 = vrot.slane %v465_v2, 1  ;;  %v477_v8 = vrot.slane %v466_v3, 1  ;;  %v468_v11 = vld [vmem:[%s464_s15 + $0x18] sm:$0xff]  ;;  %v854_v1 = vld [vmem:[%s2586_s5 + $0x48] sm:$0xff]  ;;  %s2546_s26 = scalar_lea.hbm %s2595_s14, %s1652_s20 }
  0x1e   : > { %v501_v9 = vrot.slane %v467_v4, 2  ;;  %v479_v10 = vrot.slane %v467_v4, 1  ;;  %v469_v12 = vld [vmem:[%s464_s15 + $0x20] sm:$0x3]  ;;  %v481_v17 = vrot.slane %v468_v11, 1  ;;  %v503_v21 = vrot.slane %v468_v11, 2 }
  0x1f   : > { %v500_v13 = vsel %vm497_vm1, %v498_v5, %v499_v6  ;;  %v478_v14 = vsel %vm475_vm2, %v476_v7, %v477_v8  ;;  %v483_v18 = vrot.slane %v469_v12, 1  ;;  %v505_v22 = vrot.slane %v469_v12, 2  ;;  %v850_v5 = vld [vmem:[%s2586_s5 + $0x28] sm:$0xff]  ;;  %v848_v7 = vld [vmem:[%s2586_s5 + $0x18] sm:$0xff]  ;;  %v867_v12 = vld [vmem:[%s2586_s5 + $0xb0] sm:$0xff]  ;;  %s1953_s17 = sshll.u32 %s2016_s28, 4  ;;  %s1954_s17 = int_to_ptr.vmem [resolvable:$false] %s1953_s17 }
  0x20   : > { %507 = vrot.lane.b32.xlu1 %v500_v13, %s2011_s25  ;;  %485 = vrot.lane.b32.xlu0 %v478_v14, %s2012_s22  ;;  %v502_v15 = vsel %vm497_vm1, %v499_v6, %v501_v9  ;;  %v480_v16 = vsel %vm475_vm2, %v477_v8, %v479_v10  ;;  %v482_v20 = vsel %vm475_vm2, %v479_v10, %v481_v17  ;;  %v849_v6 = vld [vmem:[%s2586_s5 + $0x20] sm:$0xff]  ;;  %v847_v8 = vld [vmem:[%s2586_s5 + $0x10] sm:$0xff] }
  0x21   : > { %v484_v19 = vsel %vm475_vm2, %v481_v17, %v483_v18  ;;  %v506_v23 = vsel %vm497_vm1, %v503_v21, %v505_v22  ;;  %v504_v24 = vsel %vm497_vm1, %v501_v9, %v503_v21  ;;  %v846_v9 = vld [vmem:[%s2586_s5 + $0x8] sm:$0xff]  ;;  %v845_v10 = vld [vmem:[%s2586_s5] sm:$0xff] }
  0x22   : > { %v866_v13 = vld [vmem:[%s2586_s5 + $0xa8] sm:$0xff]  ;;  %v865_v14 = vld [vmem:[%s2586_s5 + $0xa0] sm:$0xff] }
  0x23   : > { %v862_v17 = vld [vmem:[%s2586_s5 + $0x88] sm:$0xff]  ;;  %v861_v18 = vld [vmem:[%s2586_s5 + $0x80] sm:$0xff] }
  0x24   : > { %509 = vrot.lane.b32.xlu1 %v502_v15, %s2011_s25  ;;  %487 = vrot.lane.b32.xlu0 %v480_v16, %s2012_s22  ;;  %v864_v15 = vld [vmem:[%s2586_s5 + $0x98] sm:$0xff]  ;;  %v863_v16 = vld [vmem:[%s2586_s5 + $0x90] sm:$0xff] }
  0x28   : > { %491 = vrot.lane.b32.xlu1 %v484_v19, %s2012_s22  ;;  %489 = vrot.lane.b32.xlu0 %v482_v20, %s2012_s22 }
  0x2c   : > { %513 = vrot.lane.b32.xlu1 %v506_v23, %s2011_s25  ;;  %511 = vrot.lane.b32.xlu0 %v504_v24, %s2011_s25  ;;  %s1543_s25 = sshll.u32 %s459_s21, 4  ;;  %s1544_s25 = int_to_ptr.vmem [resolvable:$true] %s1543_s25 }
  0x2d   : > { %s1949_s1 = scalar_lea.vmem %s1544_s25, 16  ;;  %p1956_p0 = scmp.lt.s32.totalorder %s1544_s25, %s1954_s17 }
  0x2e   : > { %p1950_p11 = scmp.ne.s32.totalorder %s1544_s25, %s1949_s1 }
  0x30   : > { %p1951_p12 = pnand %p1950_p11, %p2130_p5 }
  0x32   : > { %p1952_p13 = pneg %p1951_p12 }
  0x92   : > { %v508_v25 = vpop.permute.xlu1 %507  ;;  %v486_v26 = vpop.permute.xlu0 %485 }
  0x93   : > { %v520_v27 = vsel %vm519_vm3, %v465_v2, %v486_v26  ;;  %v853_v2 = vld [vmem:[%s2586_s5 + $0x40] sm:$0xff] }
  0x94   : > { %v525_v28 = vsel %vm524_vm4, %v520_v27, %v508_v25 }
  0x95   : > { %1741 = vmatprep.mubr.msk.f32.mxu1 %vm538_vm5, %v525_v28 }
  0x96   : > { %v510_v29 = vpop.permute.xlu1 %509  ;;  %v488_v30 = vpop.permute.xlu0 %487 }
  0x97   : > { %v521_v31 = vsel %vm519_vm3, %v466_v3, %v488_v30  ;;  %v852_v3 = vld [vmem:[%s2586_s5 + $0x38] sm:$0xff] }
  0x98   : > { %v526_v32 = vsel %vm524_vm4, %v521_v31, %v510_v29 }
  0x99   : > { %1742 = vmatmul.mubr.msk.f32.vlgmr.msra.gmra.mxu1 %vm538_vm5, %v526_v32 }
  0x9a   : > { %v492_v33 = vpop.permute.xlu1 %491  ;;  %v490_v34 = vpop.permute.xlu0 %489 }
  0x9b   : > { %v523_v35 = vsel %vm519_vm3, %v468_v11, %v492_v33  ;;  %v522_v36 = vsel %vm519_vm3, %v467_v4, %v490_v34  ;;  %v851_v4 = vld [vmem:[%s2586_s5 + $0x30] sm:$0xff]  ;;  %v868_v11 = vld [vmem:[%s2586_s5 + $0xb8] sm:$0xff] }
  0x9e   : > { %v514_v37 = vpop.permute.xlu1 %513  ;;  %v512_v38 = vpop.permute.xlu0 %511 }
  0x9f   : > { %v528_v39 = vsel %vm524_vm4, %v523_v35, %v514_v37  ;;  %v527_v40 = vsel %vm524_vm4, %v522_v36, %v512_v38 }
  0xa0   : > { %1744 = vmatprep.mubr.msk.f32.mxu1 %vm538_vm5, %v527_v40 }
  0xa1   : > { %1745 = vmatmul.mubr.msk.f32.gmra.mxu1 %vm538_vm5, %v528_v39 }
  0xa2   : > { %1755 = vmatprep.mubr.msk.f32.mxu1 %vm646_vm6, %v644_v41 }
 0x159   : > { %v1743_v43 = vpop.f32.mrf.mxu1 }
 0x15a   : > { %v627_v49 = vadd.f32 %v1743_v43, %v1603_v45 }
 0x15b   : > { %v621_v44 = vpop.f32.mrf.mxu1 }
 0x15c   : > { %v622_v52 = vadd.f32 %v1603_v45, %v621_v44  ;;  %v641_v54 = vmax.f32 %v627_v49, 0.0 }
 0x15e   : > { %v640_v55 = vmax.f32 %v622_v52, 0.0 }
 0x161   : > { %v1746_v46 = vpop.f32.mrf.mxu1 }
 0x162   : > { %v637_v47 = vadd.f32 %v1746_v46, %v1603_v45 }
 0x163   : > { %v631_v48 = vpop.f32.mrf.mxu1 }
 0x164   : > { %v643_v50 = vmax.f32 %v637_v47, 0.0  ;;  %v632_v51 = vadd.f32 %v1603_v45, %v631_v48  ;;  %v1613_v45 = vld [vmem:[%s2587_s6] ss:$0 sm:$0xff] }
 0x166   : > { %v642_v53 = vmax.f32 %v632_v51, 0.0  ;;  %1747 = vmatprep.subr.mxu1 %v643_v50  ;;  %1758 = vmatprep.subr.mxu0 %v643_v50 }
 0x167   : > { %1748 = vmatpush3.msra.mxu1 %v643_v50  ;;  %1759 = vmatpush3.msra.mxu0 %v643_v50 }
 0x168   : > { %1749 = vmatprep.subr.mxu1 %v642_v53  ;;  %1760 = vmatprep.subr.mxu0 %v642_v53 }
 0x169   : > { %1750 = vmatpush3.msra.mxu1 %v642_v53  ;;  %1761 = vmatpush3.msra.mxu0 %v642_v53  ;;  %v957_v53 = vld [vmem:[%s2588_s7] sm:$0xff] }
 0x16a   : > { %1751 = vmatprep.subr.mxu1 %v641_v54  ;;  %1762 = vmatprep.subr.mxu0 %v641_v54 }
 0x16b   : > { %1752 = vmatpush3.msra.mxu1 %v641_v54  ;;  %1763 = vmatpush3.msra.mxu0 %v641_v54  ;;  %v1032_v54 = vld [vmem:[%s2589_s8] sm:$0xff] }
 0x16c   : > { %1753 = vmatprep.subr.mxu1 %v640_v55  ;;  %1764 = vmatprep.subr.mxu0 %v640_v55 }
 0x16d   : > { %1754 = vmatpush3.msra.mxu1 %v640_v55  ;;  %1765 = vmatpush3.msra.mxu0 %v640_v55  ;;  %v1650_v55 = vld [vmem:[%s2591_s10 + $0x178] sm:$0xff] }
 0x16e   : > { %1756 = vmatmul.mubr.msk.f32.vlgmr.msra.gmra.mxu1 %vm646_vm6, %v645_v56  ;;  %1767 = vmatmul.mubr.msk.f32.vlgmr.msra.gmra.mxu0 %vm646_vm6, %v729_v57  ;;  %v1649_v56 = vld [vmem:[%s2591_s10 + $0x170] sm:$0xff]  ;;  %v1648_v57 = vld [vmem:[%s2591_s10 + $0x168] sm:$0xff] }
 0x16f   : > { %880 = vmatprep.subr.mxu1 %v2013_v59  ;;  %1769 = vmatprep.subr.mxu0 %v2013_v59 }
 0x170   : > { %881 = vmatpush1.msra.mxu1 %v860_v58  ;;  %1773 = vmatprep.mubr.msk.f32.mxu0 %vm2015_vm9, %v2013_v59  ;;  %v1647_v58 = vld [vmem:[%s2591_s10 + $0x160] sm:$0xff] }
 0x171   : > { %882 = vmatprep.subr.mxu1 %v2013_v59 }
 0x172   : > { %883 = vmatpush1.msra.mxu1 %v859_v60  ;;  %v1646_v60 = vld [vmem:[%s2591_s10 + $0x158] sm:$0xff] }
 0x173   : > { %884 = vmatprep.subr.mxu1 %v2013_v59 }
 0x174   : > { %885 = vmatpush1.msra.mxu1 %v858_v61  ;;  %v1645_v61 = vld [vmem:[%s2591_s10 + $0x150] sm:$0xff] }
 0x175   : > { %886 = vmatprep.subr.mxu1 %v2013_v59 }
 0x176   : > { %887 = vmatpush1.msra.mxu1 %v857_v62  ;;  %v1644_v62 = vld [vmem:[%s2591_s10 + $0x148] sm:$0xff] }
 0x177   : > { %888 = vmatprep.subr.mxu1 %v2013_v59 }
 0x178   : > { %889 = vmatpush1.msra.mxu1 %v856_v63  ;;  %v1643_v63 = vld [vmem:[%s2591_s10 + $0x140] sm:$0xff] }
 0x179   : > { %890 = vmatprep.subr.mxu1 %v2013_v59 }
 0x17a   : > { %891 = vmatpush1.msra.mxu1 %v855_v0  ;;  %v1642_v0 = vld [vmem:[%s2591_s10 + $0x138] sm:$0xff] }
 0x17b   : > { %892 = vmatprep.subr.mxu1 %v2013_v59 }
 0x17c   : > { %893 = vmatpush1.msra.mxu1 %v854_v1  ;;  %v1641_v1 = vld [vmem:[%s2591_s10 + $0x130] sm:$0xff] }
 0x17d   : > { %894 = vmatprep.subr.mxu1 %v2013_v59 }
 0x17e   : > { %895 = vmatpush1.msra.mxu1 %v853_v2  ;;  %v1640_v2 = vld [vmem:[%s2591_s10 + $0x128] sm:$0xff] }
 0x17f   : > { %896 = vmatprep.subr.mxu1 %v2013_v59 }
 0x180   : > { %897 = vmatpush1.msra.mxu1 %v852_v3  ;;  %v1639_v3 = vld [vmem:[%s2591_s10 + $0x120] sm:$0xff] }
 0x181   : > { %898 = vmatprep.subr.mxu1 %v2013_v59 }
 0x182   : > { %899 = vmatpush1.msra.mxu1 %v851_v4  ;;  %v1638_v4 = vld [vmem:[%s2591_s10 + $0x118] sm:$0xff] }
 0x183   : > { %900 = vmatprep.subr.mxu1 %v2013_v59 }
 0x184   : > { %901 = vmatpush1.msra.mxu1 %v850_v5  ;;  %v1637_v5 = vld [vmem:[%s2591_s10 + $0x110] sm:$0xff] }
 0x185   : > { %902 = vmatprep.subr.mxu1 %v2013_v59 }
 0x186   : > { %903 = vmatpush1.msra.mxu1 %v849_v6 }
 0x187   : > { %904 = vmatprep.subr.mxu1 %v2013_v59 }
 0x188   : > { %905 = vmatpush1.msra.mxu1 %v848_v7 }
 0x189   : > { %906 = vmatprep.subr.mxu1 %v2013_v59 }
 0x18a   : > { %907 = vmatpush1.msra.mxu1 %v847_v8 }
 0x18b   : > { %908 = vmatprep.subr.mxu1 %v2013_v59 }
 0x18c   : > { %909 = vmatpush1.msra.mxu1 %v846_v9 }
 0x18d   : > { %910 = vmatprep.subr.mxu1 %v2013_v59 }
 0x18e   : > { %911 = vmatpush1.msra.mxu1 %v845_v10  ;;  %v1107_v10 = vld [vmem:[%s2590_s9] sm:$0x7] }
 0x18f   : > { %928 = vmatprep.subr.mxu1 %v2013_v59 }
 0x190   : > { %929 = vmatpush2.msra.mxu1 %v868_v11 }
 0x191   : > { %930 = vmatprep.subr.mxu1 %v2013_v59 }
 0x192   : > { %931 = vmatpush2.msra.mxu1 %v867_v12  ;;  %v1197_v12 = vld [vmem:[%s2591_s10 + $0x78] sm:$0xff] }
 0x193   : > { %932 = vmatprep.subr.mxu1 %v2013_v59 }
 0x194   : > { %933 = vmatpush2.msra.mxu1 %v866_v13  ;;  %v1196_v13 = vld [vmem:[%s2591_s10 + $0x70] sm:$0xff] }
 0x195   : > { %934 = vmatprep.subr.mxu1 %v2013_v59 }
 0x196   : > { %935 = vmatpush2.msra.mxu1 %v865_v14  ;;  %v1195_v14 = vld [vmem:[%s2591_s10 + $0x68] sm:$0xff] }
 0x197   : > { %936 = vmatprep.subr.mxu1 %v2013_v59 }
 0x198   : > { %937 = vmatpush2.msra.mxu1 %v864_v15  ;;  %v1194_v15 = vld [vmem:[%s2591_s10 + $0x60] sm:$0xff] }
 0x199   : > { %938 = vmatprep.subr.mxu1 %v2013_v59 }
 0x19a   : > { %939 = vmatpush2.msra.mxu1 %v863_v16  ;;  %v1193_v16 = vld [vmem:[%s2591_s10 + $0x58] sm:$0xff] }
 0x19b   : > { %940 = vmatprep.subr.mxu1 %v2013_v59 }
 0x19c   : > { %941 = vmatpush2.msra.mxu1 %v862_v17  ;;  %v1192_v17 = vld [vmem:[%s2591_s10 + $0x50] sm:$0xff] }
 0x19d   : > { %942 = vmatprep.subr.mxu1 %v2013_v59 }
 0x19e   : > { %943 = vmatpush2.msra.mxu1 %v861_v18  ;;  %v1191_v18 = vld [vmem:[%s2591_s10 + $0x48] sm:$0xff] }
 0x19f   : > { %1858 = vmatprep.subr.mxu1 %v2013_v59 }
 0x22e   : > { %v1757_v19 = vpop.f32.mrf.mxu1  ;;  %v1768_v20 = vpop.f32.mrf.mxu0 }
 0x22f   : > { %v812_v21 = vmax.f32 %v1757_v19, %v1768_v20  ;;  %v1190_v19 = vld [vmem:[%s2591_s10 + $0x40] sm:$0xff]  ;;  %v1189_v20 = vld [vmem:[%s2591_s10 + $0x38] sm:$0xff] }
 0x230   : > { %v719_v22 = vpop.f32.mrf.mxu1  ;;  %v802_v23 = vpop.f32.mrf.mxu0 }
 0x231   : > { %v817_v24 = vrot.slane %v812_v21, 7  ;;  %v811_v25 = vmax.f32 %v719_v22, %v802_v23  ;;  %v1188_v21 = vld [vmem:[%s2591_s10 + $0x30] sm:$0xff]  ;;  %v1187_v22 = vld [vmem:[%s2591_s10 + $0x28] sm:$0xff]  ;;  %v1186_v23 = vld [vmem:[%s2591_s10 + $0x20] sm:$0xff] }
 0x233   : > { %v823_v26 = vsel %vm815_vm7, %v817_v24, 0.0  ;;  %v816_v27 = vrot.slane %v811_v25, 7  ;;  %v1184_v25 = vld [vmem:[%s2591_s10 + $0x10] sm:$0xff] }
 0x234   : > { %v829_v28 = vrot.slane %v823_v26, 1  ;;  %v840_v29 = vrot.slane %v823_v26, 2  ;;  %v1183_v26 = vld [vmem:[%s2591_s10 + $0x8] sm:$0xff] }
 0x235   : > { %v818_v30 = vsel %vm815_vm7, %v816_v27, %v817_v24  ;;  %v822_v31 = vsel %vm815_vm7, 0.0, %v816_v27  ;;  %v1185_v24 = vld [vmem:[%s2591_s10 + $0x18] sm:$0xff]  ;;  %v1182_v27 = vld [vmem:[%s2591_s10] sm:$0xff] }
 0x236   : > { %v826_v32 = vrot.slane %v822_v31, 1  ;;  %v837_v33 = vrot.slane %v822_v31, 2  ;;  %v838_v34 = vrot.slane %v818_v30, 2  ;;  %v827_v35 = vrot.slane %v818_v30, 1 }
 0x238   : > { %v839_v36 = vsel %vm497_vm1, %v837_v33, %v838_v34  ;;  %v830_v37 = vsel %vm475_vm2, %v827_v35, %v829_v28  ;;  %v828_v38 = vsel %vm475_vm2, %v826_v32, %v827_v35  ;;  %v841_v39 = vsel %vm497_vm1, %v838_v34, %v840_v29  ;;  %v1636_v28 = vld [vmem:[%s2591_s10 + $0x108] sm:$0xff]  ;;  %v1635_v29 = vld [vmem:[%s2591_s10 + $0x100] sm:$0xff]  ;;  %v1633_v33 = vld [vmem:[%s2591_s10 + $0xf0] sm:$0xff] }
 0x239   : > { %1614 = vmatprep.mubr.msk.f32.mxu1 %vm842_vm8, %v839_v36  ;;  %833 = vrot.lane.b32.xlu1 %v830_v37, %s2014_s18  ;;  %v1632_v35 = vld [vmem:[%s2591_s10 + $0xe8] sm:$0xff]  ;;  %v1631_v36 = vld [vmem:[%s2591_s10 + $0xe0] sm:$0xff]  ;;  %v1630_v37 = vld [vmem:[%s2591_s10 + $0xd8] sm:$0xff] }
 0x23a   : > { %831 = vrot.lane.b32.xlu0 %v828_v38, %s2014_s18  ;;  %v1629_v38 = vld [vmem:[%s2591_s10 + $0xd0] sm:$0xff]  ;;  %s1955_s18 = scalar_lea.vmem %s1954_s17, 32 }
 0x23b   : > { %p1957_p1 = scmp.lt.s32.totalorder %s1955_s18, %s1949_s1 }
 0x23d   : > { %p1958_p2 = por %p1957_p1, %p1956_p0 }
 0x23f   : > { %p1959_p3 = pnand %p1958_p2, %p1952_p13 }
 0x2ab   : > { %v834_v42 = vpop.permute.xlu1 %833 }
 0x2ac   : > { %v832_v40 = vpop.permute.xlu0 %831  ;;  %v844_v43 = vsel %vm842_vm8, %v818_v30, %v834_v42  ;;  %v1634_v30 = vld [vmem:[%s2591_s10 + $0xf8] sm:$0xff]  ;;  %v1625_v42 = vld [vmem:[%s2591_s10 + $0xb0] sm:$0xff] }
 0x2ad   : > { %v843_v41 = vsel %vm842_vm8, %v822_v31, %v832_v40  ;;  %v1627_v40 = vld [vmem:[%s2591_s10 + $0xc0] sm:$0xff] }
 0x2ae   : > { %945 = vmatmul.mubr.f32.vlgmr.msra.gmra.mxu1 %v843_v41  ;;  %v1626_v41 = vld [vmem:[%s2591_s10 + $0xb8] sm:$0xff] }
 0x2af   : > { %1615 = vmatprep.mubr.msk.f32.mxu1 %vm842_vm8, %v841_v39  ;;  %1859 = vmatpush3.msra.mxu1 %v1650_v55  ;;  %v1628_v39 = vld [vmem:[%s2591_s10 + $0xc8] sm:$0xff] }
 0x2b0   : > { %1860 = vmatprep.subr.mxu1 %v2013_v59 }
 0x2b1   : > { %1861 = vmatpush3.msra.mxu1 %v1649_v56 }
 0x2b2   : > { %950 = vmatmul.mubr.f32.gmra.mxu1 %v844_v43  ;;  %1862 = vmatprep.subr.mxu1 %v2013_v59  ;;  %v1624_v43 = vld [vmem:[%s2591_s10 + $0xa8] sm:$0xff] }
 0x2b3   : > { %1890 = vmatprep.mubr.msk.f32.mxu1 %vm2015_vm9, %v2013_v59  ;;  %1863 = vmatpush3.msra.mxu1 %v1648_v57 }
 0x2b4   : > { %1864 = vmatprep.subr.mxu1 %v2013_v59 }
 0x2b5   : > { %1865 = vmatpush3.msra.mxu1 %v1647_v58  ;;  %v1181_v58 = vld [vmem:[%s2592_s11] sm:$0x1] }
 0x2b6   : > { %1866 = vmatprep.subr.mxu1 %v2013_v59 }
 0x2b7   : > { %1867 = vmatpush3.msra.mxu1 %v1646_v60 }
 0x2b8   : > { %1868 = vmatprep.subr.mxu1 %v2013_v59 }
 0x2b9   : > { %1869 = vmatpush3.msra.mxu1 %v1645_v61 }
 0x2ba   : > { %1870 = vmatprep.subr.mxu1 %v2013_v59 }
 0x2bb   : > { %1871 = vmatpush3.msra.mxu1 %v1644_v62 }
 0x2bc   : > { %1872 = vmatprep.subr.mxu1 %v2013_v59 }
 0x2bd   : > { %1873 = vmatpush3.msra.mxu1 %v1643_v63 }
 0x2be   : > { %1874 = vmatprep.subr.mxu1 %v2013_v59 }
 0x2bf   : > { %1875 = vmatpush3.msra.mxu1 %v1642_v0 }
 0x2c0   : > { %1876 = vmatprep.subr.mxu1 %v2013_v59 }
 0x2c1   : > { %1877 = vmatpush3.msra.mxu1 %v1641_v1  ;;  %v1455_v1 = vld [vmem:[%s2594_s13] sm:$0x1] }
 0x2c2   : > { %1878 = vmatprep.subr.mxu1 %v2013_v59 }
 0x2c3   : > { %1879 = vmatpush3.msra.mxu1 %v1640_v2 }
 0x2c4   : > { %1880 = vmatprep.subr.mxu1 %v2013_v59 }
 0x2c5   : > { %1881 = vmatpush3.msra.mxu1 %v1639_v3 }
 0x2c6   : > { %1882 = vmatprep.subr.mxu1 %v2013_v59 }
 0x2c7   : > { %1883 = vmatpush3.msra.mxu1 %v1638_v4 }
 0x2c8   : > { %1884 = vmatprep.subr.mxu1 %v2013_v59 }
 0x2c9   : > { %1885 = vmatpush3.msra.mxu1 %v1637_v5 }
 0x2ca   : > { %1886 = vmatprep.subr.mxu1 %v2013_v59 }
 0x2cb   : > { %1887 = vmatpush3.msra.mxu1 %v1636_v28 }
 0x2cc   : > { %1888 = vmatprep.subr.mxu1 %v2013_v59 }
 0x2cd   : > { %1889 = vmatpush3.msra.mxu1 %v1635_v29 }
 0x36e   : > { %v946_v44 = vpop.f32.mrf.mxu1 }
 0x36f   : > { %v947_v48 = vadd.f32 %v1613_v45, %v946_v44  ;;  %v1623_v44 = vld [vmem:[%s2591_s10 + $0xa0] sm:$0xff] }
 0x370   : > { %v948_v46 = vpop.f32.mrf.mxu1 }
 0x371   : > { %v955_v52 = vmax.f32 %v947_v48, 0.0  ;;  %v1621_v46 = vld [vmem:[%s2591_s10 + $0x90] sm:$0xff]  ;;  %v1619_v48 = vld [vmem:[%s2591_s10 + $0x80] sm:$0xff] }
 0x372   : > { %v951_v47 = vpop.f32.mrf.mxu1 }
 0x373   : > { %v952_v49 = vadd.f32 %v1613_v45, %v951_v47  ;;  %v1622_v45 = vld [vmem:[%s2591_s10 + $0x98] sm:$0xff]  ;;  %v1620_v47 = vld [vmem:[%s2591_s10 + $0x88] sm:$0xff] }
 0x374   : > { %v953_v50 = vpop.f32.mrf.mxu1 }
 0x375   : > { %v956_v51 = vmax.f32 %v952_v49, 0.0  ;;  %v1454_v50 = vld [vmem:[%s2593_s12 + $0x18] sm:$0xff] }
 0x377   : > { %1770 = vmatpush3.msra.mxu0 %v956_v51 }
 0x378   : > { %1771 = vmatprep.subr.mxu0 %v2013_v59 }
 0x379   : > { %1772 = vmatpush3.msra.mxu0 %v955_v52 }
 0x37a   : > { %1774 = vmatmul.mubr.msk.f32.vlgmr.msra.gmra.mxu0 %vm958_vm10, %v957_v53  ;;  %1776 = vmatprep.subr.mxu0 %v2013_v59  ;;  %v1451_v53 = vld [vmem:[%s2593_s12] sm:$0xff] }
 0x37b   : > { %1777 = vmatpush3.msra.mxu0 %v956_v51  ;;  %1780 = vmatprep.mubr.msk.f32.mxu0 %vm2015_vm9, %v2013_v59  ;;  %v1453_v51 = vld [vmem:[%s2593_s12 + $0x10] sm:$0xff] }
 0x37c   : > { %1778 = vmatprep.subr.mxu0 %v2013_v59 }
 0x37d   : > { %1779 = vmatpush3.msra.mxu0 %v955_v52  ;;  %v1452_v52 = vld [vmem:[%s2593_s12 + $0x8] sm:$0xff] }
 0x37e   : > { %1781 = vmatmul.mubr.msk.f32.vlgmr.msra.gmra.mxu0 %vm958_vm10, %v1032_v54  ;;  %1783 = vmatprep.subr.mxu0 %v2013_v59 }
 0x37f   : > { %1785 = vmatprep.mubr.msk.f32.mxu0 %vm2015_vm9, %v2013_v59 }
 0x43a   : > { %v1028_v6 = vpop.f32.mrf.mxu0 }
 0x43c   : > { %v1775_v7 = vpop.f32.mrf.mxu0 }
 0x43e   : > { %v1102_v8 = vpop.f32.mrf.mxu0 }
 0x43f   : > { %v1106_v9 = vmax.f32 %v1028_v6, %v1102_v8 }
 0x440   : > { %v1782_v11 = vpop.f32.mrf.mxu0 }
 0x441   : > { %1784 = vmatpush3.msra.mxu0 %v1106_v9 }
 0x442   : > { %1786 = vmatmul.mubr.msk.f32.vlgmr.msra.gmra.mxu0 %vm524_vm4, %v1107_v10  ;;  %1788 = vmatprep.subr.mxu0 %v2013_v59 }
 0x443   : > { %1789 = vmatpush3.msra.mxu0 %v1197_v12  ;;  %1820 = vmatprep.mubr.msk.f32.mxu0 %vm2015_vm9, %v2013_v59 }
 0x444   : > { %1790 = vmatprep.subr.mxu0 %v2013_v59 }
 0x445   : > { %1791 = vmatpush3.msra.mxu0 %v1196_v13 }
 0x446   : > { %1792 = vmatprep.subr.mxu0 %v2013_v59 }
 0x447   : > { %1793 = vmatpush3.msra.mxu0 %v1195_v14 }
 0x448   : > { %1794 = vmatprep.subr.mxu0 %v2013_v59 }
 0x449   : > { %1795 = vmatpush3.msra.mxu0 %v1194_v15 }
 0x44a   : > { %1796 = vmatprep.subr.mxu0 %v2013_v59 }
 0x44b   : > { %1797 = vmatpush3.msra.mxu0 %v1193_v16 }
 0x44c   : > { %1798 = vmatprep.subr.mxu0 %v2013_v59 }
 0x44d   : > { %1799 = vmatpush3.msra.mxu0 %v1192_v17 }
 0x44e   : > { %1800 = vmatprep.subr.mxu0 %v2013_v59 }
 0x44f   : > { %1801 = vmatpush3.msra.mxu0 %v1191_v18 }
 0x450   : > { %1802 = vmatprep.subr.mxu0 %v2013_v59 }
 0x451   : > { %1803 = vmatpush3.msra.mxu0 %v1190_v19 }
 0x452   : > { %1804 = vmatprep.subr.mxu0 %v2013_v59 }
 0x453   : > { %1805 = vmatpush3.msra.mxu0 %v1189_v20 }
 0x454   : > { %1806 = vmatprep.subr.mxu0 %v2013_v59 }
 0x455   : > { %1807 = vmatpush3.msra.mxu0 %v1188_v21 }
 0x456   : > { %1808 = vmatprep.subr.mxu0 %v2013_v59 }
 0x457   : > { %1809 = vmatpush3.msra.mxu0 %v1187_v22 }
 0x458   : > { %1810 = vmatprep.subr.mxu0 %v2013_v59 }
 0x459   : > { %1811 = vmatpush3.msra.mxu0 %v1186_v23 }
 0x45a   : > { %1812 = vmatprep.subr.mxu0 %v2013_v59 }
 0x45b   : > { %1813 = vmatpush3.msra.mxu0 %v1185_v24 }
 0x45c   : > { %1814 = vmatprep.subr.mxu0 %v2013_v59 }
 0x45d   : > { %1815 = vmatpush3.msra.mxu0 %v1184_v25 }
 0x45e   : > { %1816 = vmatprep.subr.mxu0 %v2013_v59 }
 0x45f   : > { %1817 = vmatpush3.msra.mxu0 %v1183_v26 }
 0x460   : > { %1818 = vmatprep.subr.mxu0 %v2013_v59 }
 0x461   : > { %1819 = vmatpush3.msra.mxu0 %v1182_v27 }
 0x462   : > { %1823 = vmatprep.subr.mxu0 %v2013_v59 }
 0x502   : > { %v1177_v31 = vpop.f32.mrf.mxu0 }
 0x503   : > { %v1377_v32 = vrot.slane %v1177_v31, 2  ;;  %1821 = vmatmul.mubr.f32.vlgmr.msra.gmra.mxu0 %v1177_v31  ;;  %v1287_v49 = vrot.slane %v1177_v31, 1 }
 0x504   : > { %1824 = vmatpush3.msra.mxu0 %v1634_v30  ;;  %v1787_v34 = vpop.f32.mrf.mxu0  ;;  %1855 = vmatprep.mubr.msk.f32.mxu0 %vm2015_vm9, %v2013_v59 }
 0x505   : > { %1825 = vmatprep.subr.mxu0 %v2013_v59  ;;  %1891 = vmatmul.mubr.f32.vlgmr.msra.gmra.mxu1 %v1377_v32 }
 0x506   : > { %1826 = vmatpush3.msra.mxu0 %v1633_v33 }
 0x507   : > { %1827 = vmatprep.subr.mxu0 %v2013_v59 }
 0x508   : > { %1828 = vmatpush3.msra.mxu0 %v1632_v35 }
 0x509   : > { %1829 = vmatprep.subr.mxu0 %v2013_v59 }
 0x50a   : > { %1830 = vmatpush3.msra.mxu0 %v1631_v36 }
 0x50b   : > { %1831 = vmatprep.subr.mxu0 %v2013_v59 }
 0x50c   : > { %1832 = vmatpush3.msra.mxu0 %v1630_v37 }
 0x50d   : > { %1833 = vmatprep.subr.mxu0 %v2013_v59 }
 0x50e   : > { %1834 = vmatpush3.msra.mxu0 %v1629_v38 }
 0x50f   : > { %1835 = vmatprep.subr.mxu0 %v2013_v59 }
 0x510   : > { %1836 = vmatpush3.msra.mxu0 %v1628_v39 }
 0x511   : > { %1837 = vmatprep.subr.mxu0 %v2013_v59 }
 0x512   : > { %1838 = vmatpush3.msra.mxu0 %v1627_v40 }
 0x513   : > { %1839 = vmatprep.subr.mxu0 %v2013_v59 }
 0x514   : > { %1840 = vmatpush3.msra.mxu0 %v1626_v41 }
 0x515   : > { %1841 = vmatprep.subr.mxu0 %v2013_v59 }
 0x516   : > { %1842 = vmatpush3.msra.mxu0 %v1625_v42 }
 0x517   : > { %1843 = vmatprep.subr.mxu0 %v2013_v59 }
 0x518   : > { %1844 = vmatpush3.msra.mxu0 %v1624_v43 }
 0x519   : > { %1845 = vmatprep.subr.mxu0 %v2013_v59 }
 0x51a   : > { %1846 = vmatpush3.msra.mxu0 %v1623_v44 }
 0x51b   : > { %1847 = vmatprep.subr.mxu0 %v2013_v59 }
 0x51c   : > { %1848 = vmatpush3.msra.mxu0 %v1622_v45 }
 0x51d   : > { %1849 = vmatprep.subr.mxu0 %v2013_v59 }
 0x51e   : > { %1850 = vmatpush3.msra.mxu0 %v1621_v46 }
 0x51f   : > { %1851 = vmatprep.subr.mxu0 %v2013_v59 }
 0x520   : > { %1852 = vmatpush3.msra.mxu0 %v1620_v47 }
 0x521   : > { %1853 = vmatprep.subr.mxu0 %v2013_v59 }
 0x522   : > { %1854 = vmatpush3.msra.mxu0 %v1619_v48 }
 0x523   : > { %1856 = vmatmul.mubr.f32.vlgmr.msra.gmra.mxu0 %v1287_v49  ;;  %1893 = vmatprep.subr.mxu0 %v2013_v59 }
 0x524   : > { %1901 = vmatprep.mubr.msk.f32.mxu0 %vm2015_vm9, %v2013_v59  ;;  %1894 = vmatpush3.msra.mxu0 %v1454_v50 }
 0x525   : > { %1895 = vmatprep.subr.mxu0 %v2013_v59 }
 0x526   : > { %1896 = vmatpush3.msra.mxu0 %v1453_v51 }
 0x527   : > { %1897 = vmatprep.subr.mxu0 %v2013_v59 }
 0x528   : > { %1898 = vmatpush3.msra.mxu0 %v1452_v52 }
 0x529   : > { %1899 = vmatprep.subr.mxu0 %v2013_v59 }
 0x52a   : > { %1900 = vmatpush3.msra.mxu0 %v1451_v53 }
 0x5c3   : > { %v1264_v54 = vpop.f32.mrf.mxu0 }
 0x5c4   : > { %v1268_v60 = vadd.f32 %v1264_v54, %v1181_v58 }
 0x5c5   : > { %v1822_v55 = vpop.f32.mrf.mxu0  ;;  %v1445_v56 = vpop.f32.mrf.mxu1 }
 0x5c7   : > { %v1892_v57 = vpop.f32.mrf.mxu1 }
 0x5e3   : > { %v1355_v61 = vpop.f32.mrf.mxu0 }
 0x5e4   : > { %v1359_v62 = vadd.f32 %v1355_v61, %v1268_v60 }
 0x5e5   : > { %v1857_v63 = vpop.f32.mrf.mxu0 }
 0x5e6   : > { %v1449_v0 = vadd.f32 %v1445_v56, %v1359_v62 }
 0x5e8   : > { %v1450_v59 = vmax.f32 %v1449_v0, 0.0 }
 0x5ea   : > { %1902 = vmatmul.mubr.msk.f32.vlgmr.msra.gmra.mxu0 %vm646_vm6, %v1450_v59 }
 0x6aa   : > { %v1525_v2 = vpop.f32.mrf.mxu0 }
 0x6ab   : > { %v1526_v3 = vadd.f32 %v1525_v2, %v1455_v1 }
 0x6ac   : > { %v1903_v4 = vpop.f32.mrf.mxu0 }
 0x6ad   : > { %1529 = vst [vmem:[%s459_s21] sm:$0x1] %v1526_v3 }
 0x6ae   : > { %1962 = shalt.err (!%p1959_p3)
}
 0x6af   : > { %s1963_s20 = scalar_lea.hbm %s2546_s26, 16  ;;  %s1967_s22 = scalar_lea.hbm %s2595_s14, 32 }
 0x6b0   : > { %p1964_p4 = scmp.ne.s32.totalorder %s2546_s26, %s1963_s20  ;;  %p1968_p9 = scmp.lt.s32.totalorder %s2546_s26, %s2595_s14 }
 0x6b1   : > { %p1969_p10 = scmp.lt.s32.totalorder %s1967_s22, %s1963_s20 }
 0x6b2   : > { %p1965_p7 = pnand %p1964_p4, %p2130_p5 }
 0x6b3   : > { %p1970_p11 = por %p1969_p10, %p1968_p9 }
 0x6b4   : > { %p1966_p8 = pneg %p1965_p7 }
 0x6b6   : > { %p1971_p12 = pnand %p1970_p11, %p1966_p8 }
 0x6b8   : > { %1974 = shalt.err (!%p1971_p12)
}
 0x6b9   : > { %1905 = dma.vmem_to_hbm [thread:$0]  (%p2130_p5), %s1544_s25, 16, %s2546_s26, %s1531_s0  }
 0x6ba PF: > { %p1911_p13 = scmp.ge.s32.totalorder %s2009_s16, 2  ;;  %s1555_s1 = sand.u32 1, %s1997_s29  }
 0x6bb   : > { %s1556_s17 = scalar_lea.sflag [#allocation3], %s1555_s1 }
 0x6bc   : > { %p1908_p0 = pnand %p1911_p13, %p2134_p6 }
 0x6be   : > { %p1909_p1 = pneg %p1908_p0 }
 0x6c0   : > { %1992 = dma.done.wait (%p1909_p1), %s1556_s17, 16  }
 0x6c1   : > { %1994 = vsyncadd (%p1909_p1), %s1556_s17, 4294967280  ;;  %s2605_s18 = sld [smem:[#allocation5_spill]]  ;;  %p24_p2 = scmp.ge.s32.totalorder %s2117_s19, 4  }
 0x6c2   : > { %s2606_s15 = sld [smem:[#allocation6_spill]]  ;;  %s2607_s29 = smov %s2001_s30 }
 0x6c3   : > { %s2609_s16 = smov %s2117_s19  ;;  %26 = sbr.rel (!%p24_p2) target bundleno = 6 (0x6), region = 113 }
 0x6c7   : > { %s2608_s30 = smov %s2605_s18 }
 0x6c8   :  { %1560 = vsyncpa [#allocation3], 1 }
 0x6c9   :  { %1562 = vsyncpa [#allocation3 + $0x1], 1 }

</bundles_post_ra>
